<compile_context>
chip_gen: v5e
topology: v5e:2x2
jax: 0.10.0
libtpu: 0.0.40
codegen_flags: <defaults>
</compile_context>

<pallas_src>
import functools

import jax
import jax.numpy as jnp
from jax.experimental import pallas as pl
from jax.experimental.pallas import tpu as pltpu


def _beta_tanh_kernel(beta_ref, x_ref, o_ref, *, binarize):
    x = x_ref[...]
    # Keep compute in the input dtype (avoid silent bf16 -> f32 promotion,
    # which doubles vreg pressure and VALU/EUP work on v7x).
    beta = beta_ref[0].astype(x.dtype)
    y = beta * x
    if binarize:
        # sign(tanh(beta*x)) == sign(beta*x) exactly (tanh odd, monotone,
        # sign-preserving; handles beta == 0 and beta < 0 correctly).
        out = jnp.sign(y)
    else:
        # jnp.tanh lowers to the EUP transcendental slot on TPU, leaving the
        # VALU slots free; the kernel stays HBM-bound.
        out = jnp.tanh(y)
    o_ref[...] = out.astype(o_ref.dtype)


@functools.lru_cache(maxsize=None)
def _vmem_capacity_bytes():
    try:
        cap = getattr(pltpu.get_tpu_info(), "vmem_capacity_bytes", None)
        if cap:
            return int(cap)
    except Exception:
        pass
    return 64 * 1024 * 1024  # conservative default (v7x per-TC VMEM)


def _default_tile_bytes():
    # ~vmem/8 per block => double-buffered in + out ~= vmem/2.
    return max(4 * 1024 * 1024, _vmem_capacity_bytes() // 8)


def _compiler_params(block_bytes):
    vmem_cap = _vmem_capacity_bytes()
    # double-buffered input + output = 4 x block, plus generous slack.
    limit = min(int(vmem_cap * 0.9), 4 * block_bytes + (16 << 20))
    return pltpu.CompilerParams(
        dimension_semantics=("parallel",),
        vmem_limit_bytes=limit,
    )


def _as_2d(n_elem):
    """Widest lane L in {1024,512,256,128} with n_elem % L == 0."""
    for lane in (1024, 512, 256, 128):
        if n_elem % lane == 0:
            return n_elem // lane, lane
    return None, None


def _launch_2d(x2d, beta_arr, binarize, out_dtype, tile_bytes):
    rows, lane = x2d.shape
    itemsize = jnp.dtype(x2d.dtype).itemsize
    rows_up = -(-rows // 8) * 8

    if rows <= 8:
        tr = rows  # block equals full array dim -> always a legal block shape
    else:
        # Multi-MiB tile, sublane dim a multiple of 8; partial last block is
        # handled by the pl.cdiv grid (masked writes).
        tr = max(8, (tile_bytes // (lane * itemsize)) // 8 * 8)
        if rows_up >= 16:
            # Guarantee >= 2 blocks so ("parallel",) shards the row grid
            # across both v7x TensorCores (no-op on single-TC v5e/v6e).
            tr = min(tr, max(8, (rows_up // 2) // 8 * 8))
        tr = min(tr, rows_up)
    grid = (pl.cdiv(rows, tr),)

    kernel = functools.partial(_beta_tanh_kernel, binarize=binarize)
    return pl.pallas_call(
        kernel,
        out_shape=jax.ShapeDtypeStruct((rows, lane), out_dtype),
        grid_spec=pltpu.PrefetchScalarGridSpec(
            num_scalar_prefetch=1,  # beta lives in SMEM; no retrace per beta
            grid=grid,
            in_specs=[pl.BlockSpec((tr, lane), lambda i, beta_ref: (i, 0))],
            out_specs=pl.BlockSpec((tr, lane), lambda i, beta_ref: (i, 0)),
        ),
        compiler_params=_compiler_params(tr * lane * itemsize),
    )(beta_arr, x2d)


def _launch_1d(x1d, beta_arr, binarize, out_dtype, tile_bytes):
    """Ragged numel path: masked 1D launch, no pad / slice round trips."""
    (n,) = x1d.shape
    itemsize = jnp.dtype(x1d.dtype).itemsize
    blk_target = max(1024, (tile_bytes // itemsize) // 1024 * 1024)

    if n <= blk_target:
        blk = n  # single block equal to the full array dim (always legal)
    else:
        n_up = -(-n // 1024) * 1024
        blk = blk_target
        if n_up >= 2048:
            # >= 2 blocks so both v7x TensorCores get work.
            blk = min(blk, max(1024, (n_up // 2) // 1024 * 1024))
        # Ragged last block handled by the cdiv grid (masked stores).
    grid = (pl.cdiv(n, blk),)

    kernel = functools.partial(_beta_tanh_kernel, binarize=binarize)
    return pl.pallas_call(
        kernel,
        out_shape=jax.ShapeDtypeStruct((n,), out_dtype),
        grid_spec=pltpu.PrefetchScalarGridSpec(
            num_scalar_prefetch=1,
            grid=grid,
            in_specs=[pl.BlockSpec((blk,), lambda i, beta_ref: (i,))],
            out_specs=pl.BlockSpec((blk,), lambda i, beta_ref: (i,)),
        ),
        compiler_params=_compiler_params(blk * itemsize),
    )(beta_arr, x1d)


def beta_tanh(x, beta=1.0, binarize=False, out_dtype=None, *, _tile_bytes=None):
    """BetaTanh forward pass for an NCHW (or any-shape) array.

    out_dtype: optionally emit a narrower output (e.g. bf16 for binarize=True,
    where {-1,0,1} are exact) to halve the write stream.
    """
    orig_shape = x.shape
    n = x.size
    if out_dtype is None:
        out_dtype = x.dtype
    if n == 0:
        return x.astype(out_dtype)

    binarize = bool(binarize)
    tile_bytes = _tile_bytes or _default_tile_bytes()
    beta_arr = jnp.asarray(beta, dtype=jnp.float32).reshape((1,))

    rows, lane = _as_2d(n)
    if rows is not None:
        # Common case (NCHW activations): pure reshape, no padding, no slicing.
        out2d = _launch_2d(x.reshape(rows, lane), beta_arr, binarize,
                           out_dtype, tile_bytes)
        return out2d.reshape(orig_shape)

    # Ragged numel (n % 128 != 0): masked 1D launch on the flat array.
    out1d = _launch_1d(x.reshape(-1), beta_arr, binarize, out_dtype, tile_bytes)
    return out1d.reshape(orig_shape)


if __name__ == "__main__":
    beta = 1.5

    # 1) NCHW activations (common case: numel % 128 == 0, zero-copy 2D path).
    x = jax.random.normal(jax.random.PRNGKey(0), (2, 4, 16, 16),
                          dtype=jnp.float32)
    out = jax.block_until_ready(beta_tanh(x, beta=beta, binarize=False))
    assert jnp.allclose(out, jnp.tanh(beta * x), atol=2e-6, rtol=1e-6)

    # 2) binarize=True: forward value is sign(tanh(beta*x)).
    out_b = jax.block_until_ready(beta_tanh(x, beta=beta, binarize=True))
    assert jnp.array_equal(out_b, jnp.sign(jnp.tanh(beta * x)))

    # 3) bf16 activations: compute stays in bf16 (no f32 promotion).
    x_bf = x.astype(jnp.bfloat16)
    out_bf = jax.block_until_ready(beta_tanh(x_bf, beta=beta))
    ref_bf = jnp.tanh(beta * x_bf.astype(jnp.float32)).astype(jnp.bfloat16)
    assert jnp.allclose(out_bf.astype(jnp.float32), ref_bf.astype(jnp.float32),
                        atol=2e-2)

    # 4) 2D multi-block with masked partial last block (rows % tr != 0,
    #    grid > 1), forced via a small per-block tile budget.
    x_mb = jax.random.normal(jax.random.PRNGKey(2), (15, 1024),
                             dtype=jnp.float32)
    out_mb = jax.block_until_ready(
        beta_tanh(x_mb, beta=beta, _tile_bytes=32 * 1024))
    assert jnp.allclose(out_mb, jnp.tanh(beta * x_mb), atol=2e-6, rtol=1e-6)

    # 5) ragged numel (not a multiple of 128): 1D path, single full-array block.
    x_odd = jax.random.normal(jax.random.PRNGKey(1), (3, 5, 7, 11),
                              dtype=jnp.float32)
    out_odd = jax.block_until_ready(beta_tanh(x_odd, beta=beta))
    assert jnp.allclose(out_odd, jnp.tanh(beta * x_odd), atol=2e-6, rtol=1e-6)

    # 6) ragged numel, multi-block 1D grid with masked partial last block.
    x_rag = jax.random.normal(jax.random.PRNGKey(3), (3000,),
                              dtype=jnp.float32)
    out_rag = jax.block_until_ready(
        beta_tanh(x_rag, beta=beta, _tile_bytes=4096))
    assert jnp.allclose(out_rag, jnp.tanh(beta * x_rag), atol=2e-6, rtol=1e-6)

    print("KERNEL_OK")
</pallas_src>

<mosaic_0001>
module attributes {stable_mosaic.version = 11 : i64} {
  func.func @_beta_tanh_kernel(%arg0: i32, %arg1: memref<1xf32, #tpu.memory_space<smem>>, %arg2: memref<2x1024xf32, #tpu.memory_space<vmem>>, %arg3: memref<2x1024xf32, #tpu.memory_space<vmem>>) attributes {dimension_semantics = [#tpu.dimension_semantics<parallel>], iteration_bounds = array<i64: 1>, scalar_prefetch = 1 : i64, scratch_operands = 0 : i64, tpu.core_type = #tpu.core_type<tc>, window_params = [{transform_indices = @transform_0, window_bounds = array<i64: 2, 1024>}, {transform_indices = @transform_1, window_bounds = array<i64: 2, 1024>}]} {
    %c0 = arith.constant 0 : index
    %c0_0 = arith.constant 0 : index
    %0 = vector.load %arg2[%c0, %c0_0] : memref<2x1024xf32, #tpu.memory_space<vmem>>, vector<2x1024xf32>
    %c0_1 = arith.constant 0 : index
    %1 = memref.load %arg1[%c0_1] : memref<1xf32, #tpu.memory_space<smem>>
    %2 = vector.broadcast %1 : f32 to vector<2x1024xf32>
    %3 = arith.mulf %2, %0 : vector<2x1024xf32>
    %4 = math.tanh %3 : vector<2x1024xf32>
    %c0_2 = arith.constant 0 : index
    %c0_3 = arith.constant 0 : index
    %5 = vector.load %arg3[%c0_2, %c0_3] : memref<2x1024xf32, #tpu.memory_space<vmem>>, vector<2x1024xf32>
    tpu.vector_store %arg3[%c0_2, %c0_3], %4 {strides = array<i32>} : memref<2x1024xf32, #tpu.memory_space<vmem>>, vector<2x1024xf32>,
    return
  }
  func.func @transform_0(%arg0: i32, %arg1: memref<1xf32, #tpu.memory_space<smem>>) -> (i32, i32) {
    %c0_i32 = arith.constant 0 : i32
    %c0_i32_0 = arith.constant 0 : i32
    return %arg0, %c0_i32 : i32, i32
  }
  func.func @transform_1(%arg0: i32, %arg1: memref<1xf32, #tpu.memory_space<smem>>) -> (i32, i32) {
    %c0_i32 = arith.constant 0 : i32
    %c0_i32_0 = arith.constant 0 : i32
    return %arg0, %c0_i32 : i32, i32
  }
}

</mosaic_0001>

<bundles_post_ra>
// kernel: tpu_custom_call.1
= control target key start
LH: loop header
LB: loop body
LE: loop exit
PB: predicated region body
PF: predicated region fallthrough
CT: control target
= control target key end

     0   :  { %8 = vsyncpa [#allocation5], 0  ;;  %s136_s0 = inlined_call_operand.<no memory space> [shape: f32[1], index: 0, kind: input, shape index: {}]   ;;  %s137_s1 = inlined_call_operand.hbm [shape: f32[2,1024], index: 1, kind: input, shape index: {}]   ;;  %s138_s2 = inlined_call_operand.hbm [shape: f32[2,1024], index: 2, kind: output, shape index: {}]  }
   0x1   :  { %9 = vsyncpa [#allocation6], 0  ;;  %s15_s11 = sshll.u32 %s137_s1, 4  ;;  %s110_s12 = smov [#allocation4]   ;;  %s16_s11 = int_to_ptr.hbm [resolvable:$true] %s15_s11 }
   0x2   :  { %s17_s13 = sshll.u32 %s110_s12, 4  ;;  %s18_s13 = int_to_ptr.vmem [resolvable:$true] %s17_s13 }
   0x3   :  { %20 = dma.hbm_to_vmem [thread:$0]  %s16_s11, 256, %s18_s13, [#allocation5]  }
   0x4   :  { %106 = dma.done.wait [#allocation5], 256  }
   0x5   :  { %107 = vsyncadd [#allocation5], 4294967040  ;;  %v28_v0 = vstv %s136_s0  ;;  %v25_v1 = vld [vmem:[#allocation4] sm:$0xff]  ;;  %v26_v2 = vld [vmem:[#allocation4 + $0x8] sm:$0xff]  ;;  %s111_s16 = smov [#allocation7]   ;;  %s42_s19 = sshll.u32 %s138_s2, 4  ;;  %s43_s19 = int_to_ptr.hbm [resolvable:$true] %s42_s19 }
   0x6   :  { %v29_v3 = vmul.f32 %v28_v0, %v25_v1  ;;  %v30_v4 = vmul.f32 %v28_v0, %v26_v2  ;;  %s40_s17 = sshll.u32 %s111_s16, 4  ;;  %s41_s17 = int_to_ptr.vmem [resolvable:$true] %s40_s17 }
   0x8   :  { %54 = vtanh.f32 %v29_v3 }
   0x9   :  { %56 = vtanh.f32 %v30_v4 }
   0xe   :  { %v55_v5 = vpop.eup %54 }
   0xf   :  { %v57_v6 = vpop.eup %56  ;;  %33 = vst [vmem:[#allocation7] sm:$0xff] %v55_v5 }
  0x10   :  { %34 = vst [vmem:[#allocation7 + $0x8] sm:$0xff] %v57_v6 }
  0x11   :  { %45 = dma.vmem_to_hbm [thread:$0]  %s41_s17, 256, %s43_s19, [#allocation6]  }
  0x12   :  { %108 = dma.done.wait [#allocation6], 256  }
  0x13   :  { %109 = vsyncadd [#allocation6], 4294967040 }
  0x14   :  { %50 = vsyncpa [#allocation5], 1 }
  0x15   :  { %51 = vsyncpa [#allocation6], 1 }

</bundles_post_ra>
